<compile_context>
chip_gen: v7x
topology: tpu7x:2x2x1
jax: 0.10.0
libtpu: 0.0.40
codegen_flags: <defaults>
</compile_context>

<pallas_src>
import jax
import jax.numpy as jnp
from jax.experimental import pallas as pl
from jax.experimental.pallas import tpu as pltpu


def _make_kernel(n_rows, tile_n, needs_row_mask):
    """Builds the streaming-reduction kernel (static N / tile baked in)."""

    def kernel(yp_ref, yo_ref, media_ref, out_ref, num_acc, den_acc):
        i = pl.program_id(1)            # reduction (N) axis, innermost
        n_i = pl.num_programs(1)

        @pl.when(i == 0)
        def _init():
            num_acc[...] = jnp.zeros_like(num_acc)
            den_acc[...] = jnp.zeros_like(den_acc)

        yp = yp_ref[...].astype(jnp.float32)       # (tile_n, tile_d)
        yo = yo_ref[...].astype(jnp.float32)       # (tile_n, tile_d)
        media = media_ref[...].astype(jnp.float32)  # (1, tile_d) -> broadcasts

        diff = yp - yo
        dmm = yo - media

        if needs_row_mask:
            # Last N tile is partial: mask out-of-range rows (statically elided
            # when N % tile_n == 0).
            row = jax.lax.broadcasted_iota(jnp.int32, diff.shape, 0)
            valid = (i * tile_n + row) < n_rows
            diff = jnp.where(valid, diff, 0.0)
            dmm = jnp.where(valid, dmm, 0.0)

        num_acc[...] += jnp.sum(diff * diff, axis=0, keepdims=True)
        den_acc[...] += jnp.sum(dmm * dmm, axis=0, keepdims=True)

        @pl.when(i == n_i - 1)
        def _finalize():
            num = num_acc[...]                      # (1, tile_d)
            den = den_acc[...] + 1e-8
            f1 = 1.0 - num / den
            nanmask = jnp.isnan(f1)
            # Per-D-block partials: nan-masked sum/count of f1 (for nanmean),
            # and the total squared error (for mse/rmse).
            out_ref[0, 0] = jnp.sum(jnp.where(nanmask, 0.0, f1))
            out_ref[0, 1] = jnp.sum(jnp.where(nanmask, 0.0, 1.0))
            out_ref[0, 2] = jnp.sum(num)

    return kernel


def custom_loss4_forward(y_pred, y_obs, media, *, tile_n=512):
    """Returns (mse, nse, rmse); `mse` is the loss the torch module returns.

    y_pred / y_obs: (N, D) float32 or bfloat16 (cast to f32 in-kernel).
    media: (D,) or (1, D), broadcast over dim 0 like `self.media`.
    """
    assert y_pred.shape == y_obs.shape and y_pred.ndim == 2
    if media.ndim == 1:
        media = media.reshape(1, -1)
    n, d = y_pred.shape
    assert media.shape == (1, d)

    # --- N tiling (reduction axis, "arbitrary") -----------------------------
    if n <= tile_n:
        tile_n = n                       # single full block (no 8-divisibility needed)
    else:
        tile_n = max(8, tile_n - tile_n % 8)
    grid_n = pl.cdiv(n, tile_n)
    needs_row_mask = (n % tile_n) != 0

    # --- D tiling ("parallel"; engages both TensorCores on v7x) -------------
    if d % 128 == 0 and d > 512:
        tile_d = next(t for t in (512, 384, 256, 128) if d % t == 0)
    else:
        tile_d = d                       # full feature dim in one block
    grid_d = d // tile_d

    kernel = _make_kernel(n, tile_n, needs_row_mask)

    partials = pl.pallas_call(
        kernel,
        out_shape=jax.ShapeDtypeStruct((grid_d, 3), jnp.float32),
        grid_spec=pltpu.PrefetchScalarGridSpec(
            num_scalar_prefetch=0,
            grid=(grid_d, grid_n),
            in_specs=[
                pl.BlockSpec((tile_n, tile_d), lambda j, i: (i, j)),   # y_pred
                pl.BlockSpec((tile_n, tile_d), lambda j, i: (i, j)),   # y_obs
                pl.BlockSpec((1, tile_d), lambda j, i: (0, j)),        # media (VMEM-resident over i)
            ],
            out_specs=pl.BlockSpec((1, 3), lambda j, i: (j, 0),
                                   memory_space=pltpu.MemorySpace.SMEM),
            scratch_shapes=[pltpu.VMEM((1, tile_d), jnp.float32),      # numerator acc
                            pltpu.VMEM((1, tile_d), jnp.float32)],     # denominator acc
        ),
        compiler_params=pltpu.CompilerParams(
            dimension_semantics=("parallel", "arbitrary")),
    )(y_pred, y_obs, media)

    # Trivial cross-D-block combine (a handful of scalars).
    sum_f1 = jnp.sum(partials[:, 0])
    cnt_f1 = jnp.sum(partials[:, 1])
    sum_num = jnp.sum(partials[:, 2])

    nse = sum_f1 / cnt_f1                 # torch.nanmean(f1)
    mse = sum_num / (n * d)               # == mean(|y_pred - y_obs|**2)
    rmse = jnp.sqrt(mse)
    # TODO(synk): host-side bookkeeping (self.erros dict, losses_epoch running
    # mean, .clone().to('cpu'), ascii-chart printing) is Python state, not
    # kernel compute.
    return mse, nse, rmse


def _reference(y_pred, y_obs, media):
    diff = y_pred.astype(jnp.float32) - y_obs.astype(jnp.float32)
    numerator = jnp.sum(diff ** 2, axis=0)
    denominator = jnp.sum((y_obs.astype(jnp.float32) - media) ** 2, axis=0) + 1e-8
    f1 = 1.0 - numerator / denominator
    nse = jnp.nanmean(f1)
    mse = jnp.mean(jnp.abs(diff) ** 2)
    rmse = jnp.sqrt(mse)
    return mse, nse, rmse


if __name__ == "__main__":
    key = jax.random.PRNGKey(0)
    k1, k2, k3 = jax.random.split(key, 3)

    N, D = 1000, 128  # (time/batch, features); N % tile_n != 0 exercises masking
    y_pred = jax.random.normal(k1, (N, D), dtype=jnp.float32)
    y_obs = jax.random.normal(k2, (N, D), dtype=jnp.float32)
    media = jax.random.normal(k3, (1, D), dtype=jnp.float32)

    mse, nse, rmse = custom_loss4_forward(y_pred, y_obs, media, tile_n=256)
    jax.block_until_ready((mse, nse, rmse))

    mse_ref, nse_ref, rmse_ref = _reference(y_pred, y_obs, media)
    assert jnp.allclose(mse, mse_ref, rtol=1e-4, atol=1e-5), (mse, mse_ref)
    assert jnp.allclose(nse, nse_ref, rtol=1e-4, atol=1e-5), (nse, nse_ref)
    assert jnp.allclose(rmse, rmse_ref, rtol=1e-4, atol=1e-5), (rmse, rmse_ref)

    # NaN handling check (torch.nanmean semantics for NSE; torch.mean -> NaN).
    y_obs_nan = y_obs.at[:, 5].set(jnp.nan)
    mse2, nse2, rmse2 = custom_loss4_forward(y_pred, y_obs_nan, media, tile_n=256)
    jax.block_until_ready((mse2, nse2, rmse2))
    _, nse2_ref, _ = _reference(y_pred, y_obs_nan, media)
    assert jnp.allclose(nse2, nse2_ref, rtol=1e-4, atol=1e-5), (nse2, nse2_ref)
    assert bool(jnp.isnan(mse2)), mse2

    print("KERNEL_OK")
</pallas_src>

<mosaic_0001>
module attributes {stable_mosaic.version = 11 : i64} {
  func.func @kernel(%arg0: i32, %arg1: i32, %arg2: memref<256x128xf32, #tpu.memory_space<vmem>>, %arg3: memref<256x128xf32, #tpu.memory_space<vmem>>, %arg4: memref<1x128xf32, #tpu.memory_space<vmem>>, %arg5: memref<1x3xf32, #tpu.memory_space<smem>>, %arg6: memref<1x128xf32, #tpu.memory_space<vmem>>, %arg7: memref<1x128xf32, #tpu.memory_space<vmem>>) attributes {dimension_semantics = [#tpu.dimension_semantics<parallel>, #tpu.dimension_semantics<arbitrary>], iteration_bounds = array<i64: 1, 4>, scalar_prefetch = 0 : i64, scratch_operands = 2 : i64, tpu.core_type = #tpu.core_type<tc>, window_params = [{transform_indices = @transform_0, window_bounds = array<i64: 256, 128>}, {transform_indices = @transform_1, window_bounds = array<i64: 256, 128>}, {transform_indices = @transform_2, window_bounds = array<i64: 1, 128>}, {transform_indices = @transform_3, window_bounds = array<i64: 1, 3>}]} {
    %c0_i32 = arith.constant 0 : i32
    %0 = arith.cmpi eq, %arg1, %c0_i32 : i32
    %1 = arith.extui %0 : i1 to i32
    %c0_i32_0 = arith.constant 0 : i32
    %2 = arith.cmpi ne, %1, %c0_i32_0 : i32
    scf.if %2 {
      %cst_18 = arith.constant 0.000000e+00 : f32
      %34 = vector.broadcast %cst_18 : f32 to vector<1x128xf32>
      %c0_19 = arith.constant 0 : index
      %c0_20 = arith.constant 0 : index
      %35 = vector.load %arg6[%c0_19, %c0_20] : memref<1x128xf32, #tpu.memory_space<vmem>>, vector<1x128xf32>
      tpu.vector_store %arg6[%c0_19, %c0_20], %34 {strides = array<i32>} : memref<1x128xf32, #tpu.memory_space<vmem>>, vector<1x128xf32>,
      %cst_21 = arith.constant 0.000000e+00 : f32
      %36 = vector.broadcast %cst_21 : f32 to vector<1x128xf32>
      %c0_22 = arith.constant 0 : index
      %c0_23 = arith.constant 0 : index
      %37 = vector.load %arg7[%c0_22, %c0_23] : memref<1x128xf32, #tpu.memory_space<vmem>>, vector<1x128xf32>
      tpu.vector_store %arg7[%c0_22, %c0_23], %36 {strides = array<i32>} : memref<1x128xf32, #tpu.memory_space<vmem>>, vector<1x128xf32>,
    } else {
    }
    %c0 = arith.constant 0 : index
    %c0_1 = arith.constant 0 : index
    %3 = vector.load %arg2[%c0, %c0_1] : memref<256x128xf32, #tpu.memory_space<vmem>>, vector<256x128xf32>
    %c0_2 = arith.constant 0 : index
    %c0_3 = arith.constant 0 : index
    %4 = vector.load %arg3[%c0_2, %c0_3] : memref<256x128xf32, #tpu.memory_space<vmem>>, vector<256x128xf32>
    %c0_4 = arith.constant 0 : index
    %c0_5 = arith.constant 0 : index
    %5 = vector.load %arg4[%c0_4, %c0_5] : memref<1x128xf32, #tpu.memory_space<vmem>>, vector<1x128xf32>
    %6 = arith.subf %3, %4 : vector<256x128xf32>
    %7 = vector.broadcast %5 : vector<1x128xf32> to vector<256x128xf32>
    %8 = arith.subf %4, %7 : vector<256x128xf32>
    %9 = tpu.iota {dimensions = array<i32: 0>} : vector<256x128xi32>
    %c256_i32 = arith.constant 256 : i32
    %10 = arith.muli %arg1, %c256_i32 : i32
    %11 = vector.broadcast %10 : i32 to vector<256x128xi32>
    %12 = arith.addi %11, %9 : vector<256x128xi32>
    %c1000_i32 = arith.constant 1000 : i32
    %13 = vector.broadcast %c1000_i32 : i32 to vector<256x128xi32>
    %14 = arith.cmpi slt, %12, %13 : vector<256x128xi32>
    %cst = arith.constant 0.000000e+00 : f32
    %15 = vector.broadcast %cst : f32 to vector<256x128xf32>
    %16 = arith.select %14, %6, %15 : vector<256x128xi1>, vector<256x128xf32>
    %cst_6 = arith.constant 0.000000e+00 : f32
    %17 = vector.broadcast %cst_6 : f32 to vector<256x128xf32>
    %18 = arith.select %14, %8, %17 : vector<256x128xi1>, vector<256x128xf32>
    %c0_7 = arith.constant 0 : index
    %c0_8 = arith.constant 0 : index
    %19 = vector.load %arg6[%c0_7, %c0_8] : memref<1x128xf32, #tpu.memory_space<vmem>>, vector<1x128xf32>
    %20 = arith.mulf %16, %16 : vector<256x128xf32>
    %cst_9 = arith.constant dense<0.000000e+00> : vector<128xf32>
    %21 = vector.multi_reduction <add>, %20, %cst_9 [0] : vector<256x128xf32> to vector<128xf32>
    %22 = vector.shape_cast %21 : vector<128xf32> to vector<1x128xf32>
    %23 = arith.addf %19, %22 : vector<1x128xf32>
    %c0_10 = arith.constant 0 : index
    %c0_11 = arith.constant 0 : index
    %24 = vector.load %arg6[%c0_10, %c0_11] : memref<1x128xf32, #tpu.memory_space<vmem>>, vector<1x128xf32>
    tpu.vector_store %arg6[%c0_10, %c0_11], %23 {strides = array<i32>} : memref<1x128xf32, #tpu.memory_space<vmem>>, vector<1x128xf32>,
    %c0_12 = arith.constant 0 : index
    %c0_13 = arith.constant 0 : index
    %25 = vector.load %arg7[%c0_12, %c0_13] : memref<1x128xf32, #tpu.memory_space<vmem>>, vector<1x128xf32>
    %26 = arith.mulf %18, %18 : vector<256x128xf32>
    %cst_14 = arith.constant dense<0.000000e+00> : vector<128xf32>
    %27 = vector.multi_reduction <add>, %26, %cst_14 [0] : vector<256x128xf32> to vector<128xf32>
    %28 = vector.shape_cast %27 : vector<128xf32> to vector<1x128xf32>
    %29 = arith.addf %25, %28 : vector<1x128xf32>
    %c0_15 = arith.constant 0 : index
    %c0_16 = arith.constant 0 : index
    %30 = vector.load %arg7[%c0_15, %c0_16] : memref<1x128xf32, #tpu.memory_space<vmem>>, vector<1x128xf32>
    tpu.vector_store %arg7[%c0_15, %c0_16], %29 {strides = array<i32>} : memref<1x128xf32, #tpu.memory_space<vmem>>, vector<1x128xf32>,
    %c3_i32 = arith.constant 3 : i32
    %31 = arith.cmpi eq, %arg1, %c3_i32 : i32
    %32 = arith.extui %31 : i1 to i32
    %c0_i32_17 = arith.constant 0 : i32
    %33 = arith.cmpi ne, %32, %c0_i32_17 : i32
    scf.if %33 {
      %c0_18 = arith.constant 0 : index
      %c0_19 = arith.constant 0 : index
      %34 = vector.load %arg6[%c0_18, %c0_19] : memref<1x128xf32, #tpu.memory_space<vmem>>, vector<1x128xf32>
      %c0_20 = arith.constant 0 : index
      %c0_21 = arith.constant 0 : index
      %35 = vector.load %arg7[%c0_20, %c0_21] : memref<1x128xf32, #tpu.memory_space<vmem>>, vector<1x128xf32>
      %cst_22 = arith.constant 9.99999993E-9 : f32
      %36 = vector.broadcast %cst_22 : f32 to vector<1x128xf32>
      %37 = arith.addf %35, %36 : vector<1x128xf32>
      %38 = arith.divf %34, %37 : vector<1x128xf32>
      %cst_23 = arith.constant 1.000000e+00 : f32
      %39 = vector.broadcast %cst_23 : f32 to vector<1x128xf32>
      %40 = arith.subf %39, %38 : vector<1x128xf32>
      %41 = arith.cmpf one, %40, %40 : vector<1x128xf32>
      %cst_24 = arith.constant 0.000000e+00 : f32
      %42 = vector.broadcast %cst_24 : f32 to vector<1x128xf32>
      %43 = arith.select %41, %42, %40 : vector<1x128xi1>, vector<1x128xf32>
      %44 = vector.shape_cast %43 : vector<1x128xf32> to vector<1x1x128xf32>
      %cst_25 = arith.constant dense<0.000000e+00> : vector<1xf32>
      %45 = vector.multi_reduction <add>, %44, %cst_25 [1, 2] : vector<1x1x128xf32> to vector<1xf32>
      %46 = vector.shape_cast %45 : vector<1xf32> to vector<1x1x1xf32>
      %47 = vector.extract %46[0, 0, 0] : f32 from vector<1x1x1xf32>
      %c0_26 = arith.constant 0 : index
      %c0_27 = arith.constant 0 : index
      %48 = memref.load %arg5[%c0_26, %c0_27] : memref<1x3xf32, #tpu.memory_space<smem>>
      memref.store %47, %arg5[%c0_26, %c0_27] : memref<1x3xf32, #tpu.memory_space<smem>>
      %cst_28 = arith.constant 0.000000e+00 : f32
      %cst_29 = arith.constant 1.000000e+00 : f32
      %49 = vector.broadcast %cst_28 : f32 to vector<1x128xf32>
      %50 = vector.broadcast %cst_29 : f32 to vector<1x128xf32>
      %51 = arith.select %41, %49, %50 : vector<1x128xi1>, vector<1x128xf32>
      %52 = vector.shape_cast %51 : vector<1x128xf32> to vector<1x1x128xf32>
      %cst_30 = arith.constant dense<0.000000e+00> : vector<1xf32>
      %53 = vector.multi_reduction <add>, %52, %cst_30 [1, 2] : vector<1x1x128xf32> to vector<1xf32>
      %54 = vector.shape_cast %53 : vector<1xf32> to vector<1x1x1xf32>
      %55 = vector.extract %54[0, 0, 0] : f32 from vector<1x1x1xf32>
      %c0_31 = arith.constant 0 : index
      %c1 = arith.constant 1 : index
      %56 = memref.load %arg5[%c0_31, %c1] : memref<1x3xf32, #tpu.memory_space<smem>>
      memref.store %55, %arg5[%c0_31, %c1] : memref<1x3xf32, #tpu.memory_space<smem>>
      %57 = vector.shape_cast %34 : vector<1x128xf32> to vector<1x1x128xf32>
      %cst_32 = arith.constant dense<0.000000e+00> : vector<1xf32>
      %58 = vector.multi_reduction <add>, %57, %cst_32 [1, 2] : vector<1x1x128xf32> to vector<1xf32>
      %59 = vector.shape_cast %58 : vector<1xf32> to vector<1x1x1xf32>
      %60 = vector.extract %59[0, 0, 0] : f32 from vector<1x1x1xf32>
      %c0_33 = arith.constant 0 : index
      %c2 = arith.constant 2 : index
      %61 = memref.load %arg5[%c0_33, %c2] : memref<1x3xf32, #tpu.memory_space<smem>>
      memref.store %60, %arg5[%c0_33, %c2] : memref<1x3xf32, #tpu.memory_space<smem>>
    } else {
    }
    return
  }
  func.func @transform_0(%arg0: i32, %arg1: i32) -> (i32, i32) {
    %c0_i32 = arith.constant 0 : i32
    return %arg1, %arg0 : i32, i32
  }
  func.func @transform_1(%arg0: i32, %arg1: i32) -> (i32, i32) {
    %c0_i32 = arith.constant 0 : i32
    return %arg1, %arg0 : i32, i32
  }
  func.func @transform_2(%arg0: i32, %arg1: i32) -> (i32, i32) {
    %c0_i32 = arith.constant 0 : i32
    %c0_i32_0 = arith.constant 0 : i32
    return %c0_i32, %arg0 : i32, i32
  }
  func.func @transform_3(%arg0: i32, %arg1: i32) -> (i32, i32) {
    %c0_i32 = arith.constant 0 : i32
    %c0_i32_0 = arith.constant 0 : i32
    return %arg0, %c0_i32 : i32, i32
  }
}

</mosaic_0001>

<bundles_post_ra>
// kernel: tpu_custom_call.1
= control target key start
LH: loop header
LB: loop body
LE: loop exit
PB: predicated region body
PF: predicated region fallthrough
CT: control target
= control target key end

     0   :  { %8 = vsyncpa [#allocation5], 0  ;;  %s2176_s0 = inlined_call_operand.hbm [shape: f32[1000,128], index: 0, kind: input, shape index: {}]   ;;  %s2177_s1 = inlined_call_operand.hbm [shape: f32[1000,128], index: 1, kind: input, shape index: {}]   ;;  %s2178_s2 = inlined_call_operand.vmem [shape: f32[1,128], index: 2, kind: input, shape index: {}]   ;;  %s2179_s3 = inlined_call_operand.hbm [shape: f32[1,3], index: 3, kind: output, shape index: {}]  }
   0x1   :  { %10 = vsyncpa [#allocation5 + $0x1], 0 }
   0x2   :  { %11 = vsyncpa [#allocation8], 0 }
   0x3   :  { %13 = vsyncpa [#allocation8 + $0x1], 0 }
   0x4   :  { %14 = vsyncpa [#allocation6], 0  ;;  %s1141_s12 = smov 0   ;;  %s1143_s13 = smov 0  }
   0x5   :  { %s1145_s14 = smov 0   ;;  %s1147_s15 = smov 0  }
   0x6   :  { %s1149_s16 = smov 0   ;;  %s1151_s17 = smov 0  }
   0x7 LB: > { %s882_s18 = sadd.s32 4294967295, %s1110_s17   ;;  %s29_s19 = sadd.s32 1, %s1106_s16  ;;  %s1110_s17 = sphi %s1151_s17, %s20_s17   ;;  %s1106_s16 = sphi %s1149_s16, %s2364_s16   ;;  %s1102_s15 = sphi %s1147_s15, %s2363_s15   ;;  %s1098_s14 = sphi %s1145_s14, %s2362_s14   ;;  %s1094_s13 = sphi %s1143_s13, %s2361_s13   ;;  %s1090_s12 = sphi %s1141_s12, %s2360_s12  }
   0x8   : > { %p30_p0 = scmp.ge.s32.totalorder %s29_s19, 4  ;;  %s41_s20 = sadd.s32 1, %s1098_s14 }
   0x9   : > { %p48_p1 = scmp.ne.s32.totalorder %s1098_s14, %s1094_s13  ;;  %p49_p2 = scmp.eq.s32.totalorder %s1110_s17, 0 }
   0xa   : > { %s2366_s19 = smov (%p30_p0, %s29_s19), 0  ;;  %p54_p4 = scmp.ne.s32.totalorder %s1094_s13, %s1090_s12 }
   0xb   : > { %p1177_p3 = por %p49_p2, %p48_p1  ;;  %s36_s22 = ssub.s32 %s1106_s16, %s2366_s19 }
   0xc   : > { %p55_p5 = scmp.eq.s32.totalorder %s882_s18, 0  ;;  %p39_p6 = scmp.eq.s32.totalorder %s36_s22, 0 }
   0xd   : > { %p885_p8 = scmp.ge.s32.totalorder %s1110_s17, 4 }
   0xe   : > { %p1186_p7 = por %p55_p5, %p54_p4 }
   0xf   : > { %s1191_s24 = scalar_select %p39_p6, %s1098_s14, %s41_s20  }
  0x10   : > { %160 = sbr.rel (%p885_p8) target bundleno = 93 (0x5d), region = 20 }
  0x17   : > { %163 = sbr.rel (!%p1177_p3) target bundleno = 58 (0x3a), region = 24  ;;  %s164_s25 = sand.u32 (%p1177_p3), 1, %s1098_s14  }
  0x18   : > { %s887_s26 = sshll.u32 (%p1177_p3), %s1106_s16, 5  ;;  %s886_s27 = sshll.u32 (%p1177_p3), %s164_s25, 8 }
  0x19   : > { %s170_s28 = ssub.s32 (%p1177_p3), 125, %s887_s26  ;;  %s1201_s4 = scalar_lea.sflag (%p1177_p3), [#allocation5], %s164_s25 }
  0x1a   : > { %p171_p9 = scmp.lt.s32.totalorder (%p1177_p3), %s170_s28, 32  ;;  %s168_s5 = scalar_lea.vmem (%p1177_p3), [#allocation4], %s886_s27 }
  0x1e   : > { %s2368_s28 = smov (!%p171_p9, %s170_s28), 32 }
  0x1f   : > { %s1198_s29 = sshll.u32 %s2368_s28, 7 }
  0x20   : > { %s175_s30 = ssub.s32 4096, %s1198_s29 }
  0x21   : > { %176 = vsyncadd %s1201_s4, %s175_s30  ;;  %p889_p10 = scmp.ne.s32.totalorder %s1198_s29, 0  ;;  %s911_s6 = sshll.u32 %s1106_s16, 12 }
  0x22   : > { %s1209_s9 = scalar_lea.hbm %s2176_s0, %s911_s6  ;;  %s182_s10 = sshll.u32 %s168_s5, 4  ;;  %s1211_s10 = int_to_ptr.vmem [resolvable:$true] %s182_s10 }
  0x23   : > { %s984_s11 = scalar_lea.hbm %s1209_s9, %s1198_s29  ;;  %s988_s22 = scalar_lea.hbm %s2176_s0, 16000 }
  0x24   : > { %p985_p11 = scmp.ne.s32.totalorder %s1209_s9, %s984_s11  ;;  %p989_p0 = scmp.lt.u32.totalorder %s1209_s9, %s2176_s0 }
  0x25   : > { %p990_p1 = scmp.lt.u32.totalorder %s988_s22, %s984_s11  ;;  %p992_p4 = scmp.lt.u32.totalorder %s984_s11, %s1209_s9 }
  0x26   : > { %p986_p12 = pnand %p985_p11, %p889_p10 }
  0x27   : > { %p991_p2 = por %p990_p1, %p989_p0 }
  0x28   : > { %p987_p13 = pneg %p986_p12 }
  0x29   : > { %p993_p5 = por %p992_p4, %p991_p2 }
  0x2b   : > { %p994_p6 = pnand %p993_p5, %p987_p13 }
  0x2d   : > { %997 = shalt.err (!%p994_p6)
}
  0x2e   : > { %s998_s27 = scalar_lea.vmem %s1211_s10, %s1198_s29  ;;  %s1112_s28 = smov [#allocation4]  }
  0x2f   : > { %p999_p8 = scmp.ne.s32.totalorder %s1211_s10, %s998_s27  ;;  %s1002_s30 = sshll.u32 %s1112_s28, 4  ;;  %s1003_s30 = int_to_ptr.vmem [resolvable:$false] %s1002_s30 }
  0x30   : > { %s1004_s5 = scalar_lea.vmem %s1003_s30, 8192  ;;  %p1005_p12 = scmp.lt.s32.totalorder %s1211_s10, %s1003_s30 }
  0x31   : > { %p1000_p9 = pnand %p999_p8, %p889_p10  ;;  %p1006_p0 = scmp.lt.s32.totalorder %s1004_s5, %s998_s27 }
  0x33   : > { %p1001_p11 = pneg %p1000_p9  ;;  %p1007_p1 = por %p1006_p0, %p1005_p12 }
  0x35   : > { %p1008_p2 = pnand %p1007_p1, %p1001_p11 }
  0x37   : > { %1011 = shalt.err (!%p1008_p2)
}
  0x38   : > { %s1113_s6 = smov 128   ;;  %s1114_s7 = smov 8  }
  0x39   : > { %188 = dma.hbm_to_vmem [thread:$0]  (%p889_p10), %s1209_s9, %s1198_s29, %s1211_s10, %s1201_s4, %s1113_s6, %s1113_s6, %s1114_s7  }
  0x3a PF: > { %191 = sbr.rel (!%p1177_p3) target bundleno = 93 (0x5d), region = 28  ;;  %s192_s8 = sand.u32 (%p1177_p3), 1, %s1098_s14  }
  0x3b   : > { %s894_s11 = sshll.u32 (%p1177_p3), %s1106_s16, 5  ;;  %s893_s12 = sshll.u32 (%p1177_p3), %s192_s8, 8 }
  0x3c   : > { %s198_s20 = ssub.s32 (%p1177_p3), 125, %s894_s11  ;;  %s1245_s26 = scalar_lea.sflag (%p1177_p3), [#allocation8], %s192_s8 }
  0x3d   : > { %p199_p13 = scmp.lt.s32.totalorder (%p1177_p3), %s198_s20, 32  ;;  %s196_s29 = scalar_lea.vmem (%p1177_p3), [#allocation7], %s893_s12 }
  0x41   : > { %s2370_s20 = smov (!%p199_p13, %s198_s20), 32 }
  0x42   : > { %s1242_s22 = sshll.u32 %s2370_s20, 7 }
  0x43   : > { %s203_s25 = ssub.s32 4096, %s1242_s22 }
  0x44   : > { %204 = vsyncadd %s1245_s26, %s203_s25  ;;  %p896_p3 = scmp.ne.s32.totalorder %s1242_s22, 0  ;;  %s912_s21 = sshll.u32 %s1106_s16, 12 }
  0x45   : > { %s1253_s10 = scalar_lea.hbm %s2177_s1, %s912_s21  ;;  %s210_s27 = sshll.u32 %s196_s29, 4  ;;  %s1255_s27 = int_to_ptr.vmem [resolvable:$true] %s210_s27 }
  0x46   : > { %s1012_s28 = scalar_lea.hbm %s1253_s10, %s1242_s22  ;;  %s1016_s6 = scalar_lea.hbm %s2177_s1, 16000 }
  0x47   : > { %p1013_p10 = scmp.ne.s32.totalorder %s1253_s10, %s1012_s28  ;;  %p1017_p6 = scmp.lt.u32.totalorder %s1253_s10, %s2177_s1 }
  0x48   : > { %p1018_p8 = scmp.lt.u32.totalorder %s1016_s6, %s1012_s28  ;;  %p1020_p11 = scmp.lt.u32.totalorder %s1012_s28, %s1253_s10 }
  0x49   : > { %p1014_p4 = pnand %p1013_p10, %p896_p3 }
  0x4a   : > { %p1019_p9 = por %p1018_p8, %p1017_p6 }
  0x4b   : > { %p1015_p5 = pneg %p1014_p4 }
  0x4c   : > { %p1021_p12 = por %p1020_p11, %p1019_p9 }
  0x4e   : > { %p1022_p0 = pnand %p1021_p12, %p1015_p5 }
  0x50   : > { %1025 = shalt.err (!%p1022_p0)
}
  0x51   : > { %s1026_s11 = scalar_lea.vmem %s1255_s27, %s1242_s22  ;;  %s1115_s12 = smov [#allocation7]  }
  0x52   : > { %p1027_p1 = scmp.ne.s32.totalorder %s1255_s27, %s1026_s11  ;;  %s1030_s20 = sshll.u32 %s1115_s12, 4  ;;  %s1031_s20 = int_to_ptr.vmem [resolvable:$false] %s1030_s20 }
  0x53   : > { %s1032_s25 = scalar_lea.vmem %s1031_s20, 8192  ;;  %p1033_p10 = scmp.lt.s32.totalorder %s1255_s27, %s1031_s20 }
  0x54   : > { %p1028_p2 = pnand %p1027_p1, %p896_p3  ;;  %p1034_p4 = scmp.lt.s32.totalorder %s1032_s25, %s1026_s11 }
  0x56   : > { %p1029_p13 = pneg %p1028_p2  ;;  %p1035_p6 = por %p1034_p4, %p1033_p10 }
  0x58   : > { %p1036_p8 = pnand %p1035_p6, %p1029_p13 }
  0x5a   : > { %1039 = shalt.err (!%p1036_p8)
}
  0x5b   : > { %s1116_s29 = smov 128   ;;  %s1117_s21 = smov 8  }
  0x5c   : > { %216 = dma.hbm_to_vmem [thread:$0]  (%p896_p3), %s1253_s10, %s1242_s22, %s1255_s27, %s1245_s26, %s1116_s29, %s1116_s29, %s1117_s21  }
  0x5d PF: > { %p900_p5 = scmp.ge.s32.totalorder %s1110_s17, 1  ;;  %p218_p9 = scmp.lt.s32.totalorder %s1110_s17, 5 }
  0x5f   : > { %p219_p11 = pnand %p900_p5, %p218_p9 }
  0x61   : > { %222 = sbr.rel (%p219_p11) target bundleno = 501 (0x1f5), region = 32 }
  0x68   : > { %s224_s4 = sand.u32 1, %s1094_s13  }
  0x69   : > { %s901_s9 = sshll.u32 %s224_s4, 8  ;;  %s225_s28 = scalar_lea.sflag [#allocation5], %s224_s4 }
  0x6a   : > { %s1285_s30 = scalar_lea.vmem [#allocation4], %s901_s9 }
  0x6b   : > { %1077 = dma.done.wait (%p1186_p7), %s225_s28, 4096  }
  0x6c   : > { %1079 = vsyncadd (%p1186_p7), %s225_s28, 4294963200  ;;  %s234_s22 = scalar_lea.sflag [#allocation8], %s224_s4  ;;  %s1291_s26 = scalar_lea.vmem [#allocation7], %s901_s9 }
  0x6d   : > { %1081 = dma.done.wait (%p1186_p7), %s234_s22, 4096  }
  0x6e   : > { %1083 = vsyncadd (%p1186_p7), %s234_s22, 4294963200  ;;  %p903_p3 = scmp.ne.s32.totalorder %s1102_s15, 0 }
  0x6f   : > { %v1118_v0 = vmov (!%p903_p3), 0.0  }
  0x70   : > { %279 = sbr.rel (%p903_p3) target bundleno = 119 (0x77), region = 44  ;;  %280 = vst [vmem:[#allocation2] sm:$0x1] (!%p903_p3), %v1118_v0  ;;  %281 = vst [vmem:[#allocation3] sm:$0x1] (!%p903_p3), %v1118_v0 }
  0x77 PF: > { %v417_v1 = vlaneseq  ;;  %s905_s10 = sshll.u32 %s1102_s15, 8  ;;  %v1316_v11 = vld [vmem:[%s1285_s30] sm:$0xff]  ;;  %v1331_v16 = vld [vmem:[%s1285_s30 + $0x8] sm:$0xff]  ;;  %v1334_v17 = vld [vmem:[%s1285_s30 + $0x10] sm:$0xff]  ;;  %p906_p7 = scmp.ne.s32.totalorder %s1102_s15, 3 }
  0x78   : > { %v1302_v4 = vstv %s905_s10  ;;  %v1337_v18 = vld [vmem:[%s1285_s30 + $0x18] sm:$0xff]  ;;  %v1352_v23 = vld [vmem:[%s1285_s30 + $0x20] sm:$0xff]  ;;  %v1355_v24 = vld [vmem:[%s1285_s30 + $0x28] sm:$0xff] }
  0x79   : > { %v1298_v2 = vshrl.u32 %v417_v1, 7  ;;  %2212 = vst [vmem:[#allocation14_spill] sm:$0xff] %v1337_v18  ;;  %2216 = vst [vmem:[#allocation18_spill] sm:$0xff] %v1352_v23  ;;  %v1358_v25 = vld [vmem:[%s1285_s30 + $0x30] sm:$0xff]  ;;  %v1361_v26 = vld [vmem:[%s1291_s26] sm:$0xff] }
  0x7a   : > { %2217 = vst [vmem:[#allocation19_spill] sm:$0xff] %v1355_v24  ;;  %2218 = vst [vmem:[#allocation20_spill] sm:$0xff] %v1358_v25  ;;  %v1376_v31 = vld [vmem:[%s1285_s30 + $0x38] sm:$0xff]  ;;  %v1379_v32 = vld [vmem:[%s1285_s30 + $0x40] sm:$0xff] }
  0x7b   : > { %v419_v3 = vadd.s32 8, %v1298_v2  ;;  %v420_v5 = vadd.s32 16, %v1298_v2  ;;  %v421_v6 = vadd.s32 24, %v1298_v2  ;;  %v422_v7 = vadd.s32 32, %v1298_v2  ;;  %2222 = vst [vmem:[#allocation24_spill] sm:$0xff] %v1376_v31  ;;  %2223 = vst [vmem:[#allocation25_spill] sm:$0xff] %v1379_v32 }
  0x7c   : > { %v423_v8 = vadd.s32 40, %v1298_v2  ;;  %v1309_v9 = vadd.s32 48, %v1298_v2  ;;  %v1313_v10 = vadd.s32 %v1302_v4, %v1298_v2  ;;  %v1319_v12 = vadd.s32 56, %v1298_v2  ;;  %v1382_v33 = vld [vmem:[%s1285_s30 + $0x48] sm:$0xff]  ;;  %v1388_v35 = vld [vmem:[%s1291_s26 + $0x10] sm:$0xff]  ;;  %v1391_v36 = vld [vmem:[%s1291_s26 + $0x18] sm:$0xff] }
  0x7d   : > { %v1322_v13 = vadd.s32 64, %v1298_v2  ;;  %v1325_v14 = vadd.s32 72, %v1298_v2  ;;  %v1328_v15 = vadd.s32 %v1302_v4, %v419_v3  ;;  %v1340_v19 = vadd.s32 80, %v1298_v2  ;;  %2224 = vst [vmem:[#allocation26_spill] sm:$0xff] %v1382_v33  ;;  %v1385_v34 = vld [vmem:[%s1291_s26 + $0x8] sm:$0xff]  ;;  %v1406_v41 = vld [vmem:[%s1285_s30 + $0x50] sm:$0xff] }
  0x7e   : > { %v1343_v20 = vadd.s32 88, %v1298_v2  ;;  %v1346_v21 = vadd.s32 96, %v1298_v2  ;;  %v1349_v22 = vadd.s32 %v1302_v4, %v420_v5  ;;  %v1364_v27 = vadd.s32 104, %v1298_v2  ;;  %2228 = vst [vmem:[#allocation30_spill] sm:$0xff] %v1406_v41  ;;  %v1409_v42 = vld [vmem:[%s1285_s30 + $0x58] sm:$0xff]  ;;  %v1412_v43 = vld [vmem:[%s1285_s30 + $0x60] sm:$0xff] }
  0x7f   : > { %2211 = vst [vmem:[#allocation13_spill] sm:$0xff] %v1325_v14  ;;  %2213 = vst [vmem:[#allocation15_spill] sm:$0xff] %v1340_v19  ;;  %v1367_v28 = vadd.s32 112, %v1298_v2  ;;  %v1370_v29 = vadd.s32 120, %v1298_v2  ;;  %v1373_v30 = vadd.s32 %v1302_v4, %v421_v6  ;;  %v1394_v37 = vadd.s32 128, %v1298_v2  ;;  %v1415_v44 = vld [vmem:[%s1291_s26 + $0x20] sm:$0xff] }
  0x80   : > { %2214 = vst [vmem:[#allocation16_spill] sm:$0xff] %v1343_v20  ;;  %2215 = vst [vmem:[#allocation17_spill] sm:$0xff] %v1346_v21  ;;  %v1397_v38 = vadd.s32 136, %v1298_v2  ;;  %v1400_v39 = vadd.s32 144, %v1298_v2  ;;  %v1403_v40 = vadd.s32 %v1302_v4, %v422_v7  ;;  %v1418_v45 = vld [vmem:[%s1291_s26 + $0x28] sm:$0xff]  ;;  %v1421_v46 = vld [vmem:[%s1291_s26 + $0x30] sm:$0xff]  ;;  %v1433_v50 = vadd.s32 %v1302_v4, %v423_v8 }
  0x81   : > { %2219 = vst [vmem:[#allocation21_spill] sm:$0xff] %v1364_v27  ;;  %2220 = vst [vmem:[#allocation22_spill] sm:$0xff] %v1367_v28  ;;  %v1424_v47 = vadd.s32 152, %v1298_v2  ;;  %v1427_v48 = vadd.s32 160, %v1298_v2  ;;  %v1430_v49 = vadd.s32 168, %v1298_v2  ;;  %v1436_v51 = vld [vmem:[%s1285_s30 + $0x68] sm:$0xff]  ;;  %v1664_v18 = vadd.s32 %v1302_v4, %v1319_v12 }
  0x82   : > { %2221 = vst [vmem:[#allocation23_spill] sm:$0xff] %v1370_v29  ;;  %2225 = vst [vmem:[#allocation27_spill] sm:$0xff] %v1394_v37  ;;  %v1439_v52 = vld [vmem:[%s1285_s30 + $0x70] sm:$0xff]  ;;  %v1442_v53 = vld [vmem:[%s1285_s30 + $0x78] sm:$0xff]  ;;  %v1456_v58 = vadd.s32 176, %v1298_v2  ;;  %v1459_v59 = vadd.s32 184, %v1298_v2 }
  0x83   : > { %2226 = vst [vmem:[#allocation28_spill] sm:$0xff] %v1397_v38  ;;  %2227 = vst [vmem:[#allocation29_spill] sm:$0xff] %v1400_v39  ;;  %v1445_v54 = vld [vmem:[%s1291_s26 + $0x38] sm:$0xff]  ;;  %v1448_v55 = vld [vmem:[%s1291_s26 + $0x40] sm:$0xff]  ;;  %v1462_v60 = vadd.s32 192, %v1298_v2  ;;  %v1489_v8 = vadd.s32 200, %v1298_v2 }
  0x84   : > { %2229 = vst [vmem:[#allocation31_spill] sm:$0xff] %v1409_v42  ;;  %2230 = vst [vmem:[#allocation32_spill] sm:$0xff] %v1412_v43  ;;  %v1451_v56 = vld [vmem:[%s1291_s26 + $0x48] sm:$0xff]  ;;  %v1465_v61 = vld [vmem:[%s1285_s30 + $0x80] sm:$0xff]  ;;  %v1543_v28 = vadd.s32 216, %v1298_v2  ;;  %v1570_v32 = vadd.s32 224, %v1298_v2 }
  0x85   : > { %2231 = vst [vmem:[#allocation33_spill] sm:$0xff] %v1424_v47  ;;  %2232 = vst [vmem:[#allocation34_spill] sm:$0xff] %v1427_v48  ;;  %v1468_v62 = vld [vmem:[%s1285_s30 + $0x88] sm:$0xff]  ;;  %v1471_v63 = vld [vmem:[%s1285_s30 + $0x90] sm:$0xff]  ;;  %v1516_v48 = vadd.s32 208, %v1298_v2  ;;  %v1594_v43 = vadd.s32 232, %v1298_v2 }
  0x86   : > { %2233 = vst [vmem:[#allocation35_spill] sm:$0xff] %v1430_v49  ;;  %2234 = vst [vmem:[#allocation36_spill] sm:$0xff] %v1433_v50  ;;  %v1474_v0 = vld [vmem:[%s1291_s26 + $0x50] sm:$0xff]  ;;  %v1477_v1 = vld [vmem:[%s1291_s26 + $0x58] sm:$0xff]  ;;  %vm484_vm0 = vcmp.lt.s32.totalorder %v1313_v10, 1000  ;;  %vm485_vm1 = vcmp.lt.s32.totalorder %v1328_v15, 1000 }
  0x87   : > { %2235 = vst [vmem:[#allocation37_spill] sm:$0xff] %v1436_v51  ;;  %2236 = vst [vmem:[#allocation38_spill] sm:$0xff] %v1439_v52  ;;  %v1480_v3 = vld [vmem:[%s1291_s26 + $0x60] sm:$0xff]  ;;  %v1492_v57 = vld [vmem:[%s1285_s30 + $0x98] sm:$0xff]  ;;  %vm486_vm2 = vcmp.lt.s32.totalorder %v1349_v22, 1000  ;;  %vm487_vm3 = vcmp.lt.s32.totalorder %v1373_v30, 1000 }
  0x88   : > { %2237 = vst [vmem:[#allocation39_spill] sm:$0xff] %v1442_v53  ;;  %2238 = vst [vmem:[#allocation40_spill] sm:$0xff] %v1456_v58  ;;  %v1501_v5 = vld [vmem:[%s1291_s26 + $0x68] sm:$0xff]  ;;  %v1504_v58 = vld [vmem:[%s1291_s26 + $0x70] sm:$0xff]  ;;  %vm488_vm4 = vcmp.lt.s32.totalorder %v1403_v40, 1000  ;;  %vm491_vm7 = vcmp.lt.s32.totalorder %v1664_v18, 1000 }
  0x89   : > { %2239 = vst [vmem:[#allocation41_spill] sm:$0xff] %v1459_v59  ;;  %2240 = vst [vmem:[#allocation42_spill] sm:$0xff] %v1462_v60  ;;  %v1495_v60 = vld [vmem:[%s1285_s30 + $0xa0] sm:$0xff]  ;;  %v1498_v59 = vld [vmem:[%s1285_s30 + $0xa8] sm:$0xff] }
  0x8a   : > { %2241 = vst [vmem:[#allocation43_spill] sm:$0xff] %v1468_v62  ;;  %2242 = vst [vmem:[#allocation44_spill] sm:$0xff] %v1471_v63  ;;  %v1507_v6 = vld [vmem:[%s1291_s26 + $0x78] sm:$0xff]  ;;  %v1519_v47 = vld [vmem:[%s1285_s30 + $0xb0] sm:$0xff] }
  0x8b   : > { %2243 = vst [vmem:[#allocation45_spill] sm:$0xff] %v1489_v8  ;;  %2244 = vst [vmem:[#allocation46_spill] sm:$0xff] %v1495_v60  ;;  %v1522_v39 = vld [vmem:[%s1285_s30 + $0xb8] sm:$0xff]  ;;  %v1525_v38 = vld [vmem:[%s1285_s30 + $0xc0] sm:$0xff] }
  0x8c   : > { %2245 = vst [vmem:[#allocation47_spill] sm:$0xff] %v1498_v59  ;;  %2246 = vst [vmem:[#allocation48_spill] sm:$0xff] %v1516_v48  ;;  %v1528_v7 = vld [vmem:[%s1291_s26 + $0x80] sm:$0xff]  ;;  %v1531_v37 = vld [vmem:[%s1291_s26 + $0x88] sm:$0xff] }
  0x8d   : > { %v1534_v8 = vld [vmem:[%s1291_s26 + $0x90] sm:$0xff]  ;;  %2247 = vst [vmem:[#allocation49_spill] sm:$0xff] %v1543_v28  ;;  %v1546_v27 = vld [vmem:[%s1285_s30 + $0xc8] sm:$0xff]  ;;  %v1552_v20 = vld [vmem:[%s1285_s30 + $0xd8] sm:$0xff] }
  0x8e   : > { %v1549_v21 = vld [vmem:[%s1285_s30 + $0xd0] sm:$0xff]  ;;  %v1555_v25 = vld [vmem:[%s1291_s26 + $0x98] sm:$0xff]  ;;  %v1558_v49 = vld [vmem:[%s1291_s26 + $0xa0] sm:$0xff]  ;;  %2248 = vst [vmem:[#allocation50_spill] sm:$0xff] %v1570_v32  ;;  %v1633_v32 = vadd.s32 248, %v1298_v2 }
  0x8f   : > { %v1561_v48 = vld [vmem:[%s1291_s26 + $0xa8] sm:$0xff]  ;;  %v1573_v31 = vld [vmem:[%s1285_s30 + $0xe0] sm:$0xff]  ;;  %v1579_v24 = vld [vmem:[%s1291_s26 + $0xb0] sm:$0xff]  ;;  %2250 = vst [vmem:[#allocation52_spill] sm:$0xff] %v1594_v43  ;;  %v1615_v43 = vadd.s32 240, %v1298_v2  ;;  %v1654_v2 = vadd.s32 %v1302_v4, %v1309_v9 }
  0x90   : > { %v1576_v19 = vld [vmem:[%s1285_s30 + $0xe8] sm:$0xff]  ;;  %v1582_v14 = vld [vmem:[%s1291_s26 + $0xb8] sm:$0xff]  ;;  %v1585_v29 = vld [vmem:[%s1291_s26 + $0xc0] sm:$0xff]  ;;  %2256 = vst [vmem:[#allocation58_spill] sm:$0xff] %v1633_v32  ;;  %v1680_v32 = vadd.s32 %v1302_v4, %v1322_v13  ;;  %v2259_v13 = vsub.f32 %v1316_v11, %v1361_v26 }
  0x91   : > { %2249 = vst [vmem:[#allocation51_spill] sm:$0xff] %v1576_v19  ;;  %v1597_v42 = vld [vmem:[%s1285_s30 + $0xf0] sm:$0xff]  ;;  %v1600_v41 = vld [vmem:[%s1291_s26 + $0xc8] sm:$0xff]  ;;  %v1606_v50 = vld [vmem:[%s1291_s26 + $0xd8] sm:$0xff]  ;;  %vm490_vm6 = vcmp.lt.s32.totalorder %v1654_v2, 1000 }
  0x92   : > { %2251 = vst [vmem:[#allocation53_spill] sm:$0xff] %v1597_v42  ;;  %v1603_v23 = vld [vmem:[%s1291_s26 + $0xd0] sm:$0xff]  ;;  %2252 = vst [vmem:[#allocation54_spill] sm:$0xff] %v1615_v43  ;;  %v1618_v53 = vld [vmem:[%s1285_s30 + $0xf8] sm:$0xff]  ;;  %vm492_vm8 = vcmp.lt.s32.totalorder %v1680_v32, 1000 }
  0x93   : > { %2253 = vst [vmem:[#allocation55_spill] sm:$0xff] %v1618_v53  ;;  %v1621_v52 = vld [vmem:[%s1291_s26 + $0xe0] sm:$0xff]  ;;  %v1624_v51 = vld [vmem:[%s1291_s26 + $0xe8] sm:$0xff]  ;;  %v1636_v63 = vld [vmem:[%s1291_s26 + $0xf0] sm:$0xff]  ;;  %v2260_v53 = vsub.f32 %v1331_v16, %v1385_v34 }
  0x94   : > { %2254 = vst [vmem:[#allocation56_spill] sm:$0xff] %v1621_v52  ;;  %2255 = vst [vmem:[#allocation57_spill] sm:$0xff] %v1624_v51  ;;  %v1639_v43 = vld [vmem:[%s1291_s26 + $0xf8] sm:$0xff] }
  0x95   : > { %2257 = vst [vmem:[#allocation59_spill] sm:$0xff] %v1636_v63  ;;  %2258 = vst [vmem:[#allocation60_spill] sm:$0xff] %v1639_v43  ;;  %v1644_v62 = vld [vmem:[%s2178_s2] ss:$0 sm:$0xff]  ;;  %v516_v43 = vsel %vm484_vm0, %v2259_v13, 0.0  ;;  %v517_v63 = vsel %vm485_vm1, %v2260_v53, 0.0 }
  0x96   : > { %v385_v12 = vsub.f32 %v1361_v26, %v1644_v62  ;;  %v386_v9 = vsub.f32 %v1385_v34, %v1644_v62  ;;  %v387_v33 = vsub.f32 %v1388_v35, %v1644_v62  ;;  %v388_v28 = vsub.f32 %v1391_v36, %v1644_v62  ;;  %v2267_v26 = vld [vmem:[#allocation13_spill] sm:$0xff]  ;;  %v2271_v52 = vld [vmem:[#allocation20_spill] sm:$0xff] }
  0x97   : > { %v389_v60 = vsub.f32 %v1415_v44, %v1644_v62  ;;  %v2261_v34 = vsub.f32 %v1334_v17, %v1388_v35  ;;  %v581_v59 = vmul.f32 %v516_v43, %v516_v43  ;;  %v582_v51 = vmul.f32 %v517_v63, %v517_v63  ;;  %v2262_v17 = vld [vmem:[#allocation14_spill] sm:$0xff]  ;;  %v2264_v63 = vld [vmem:[#allocation36_spill] sm:$0xff] }
  0x98   : > { %v2263_v35 = vsub.f32 %v2262_v17, %v1391_v36  ;;  %vm489_vm5 = vcmp.lt.s32.totalorder %v2264_v63, 1000  ;;  %v2265_v17 = vld [vmem:[#allocation18_spill] sm:$0xff]  ;;  %v1758_v19 = vadd.s32 %v1302_v4, %v2267_v26  ;;  %v548_v43 = vsel %vm484_vm0, %v385_v12, 0.0  ;;  %v2270_v36 = vld [vmem:[#allocation15_spill] sm:$0xff]  ;;  %v2273_v12 = vld [vmem:[#allocation16_spill] sm:$0xff] }
  0x99   : > { %v518_v53 = vsel %vm486_vm2, %v2261_v34, 0.0  ;;  %v613_v42 = vadd.f32 %v582_v51, %v581_v59  ;;  %v549_v51 = vsel %vm485_vm1, %v386_v9, 0.0  ;;  %v550_v15 = vsel %vm486_vm2, %v387_v33, 0.0 }
  0x9a   : > { %v519_v34 = vsel %vm487_vm3, %v2263_v35, 0.0  ;;  %v583_v11 = vmul.f32 %v518_v53, %v518_v53  ;;  %v2266_v35 = vsub.f32 %v2265_v17, %v1415_v44  ;;  %v2268_v44 = vld [vmem:[#allocation19_spill] sm:$0xff]  ;;  %v653_v16 = vmul.f32 %v548_v43, %v548_v43 }
  0x9b   : > { %v584_v53 = vmul.f32 %v519_v34, %v519_v34  ;;  %v2269_v17 = vsub.f32 %v2268_v44, %v1418_v45  ;;  %v1776_v44 = vadd.s32 %v1302_v4, %v2270_v36  ;;  %v654_v26 = vmul.f32 %v549_v51, %v549_v51 }
  0x9c   : > { %v520_v13 = vsel %vm488_vm4, %v2266_v35, 0.0  ;;  %v614_v34 = vadd.f32 %v613_v42, %v583_v11  ;;  %v1788_v11 = vadd.s32 %v1302_v4, %v2273_v12  ;;  %vm493_vm9 = vcmp.lt.s32.totalorder %v1758_v19, 1000  ;;  %v2277_v12 = vld [vmem:[#allocation25_spill] sm:$0xff] }
  0x9d   : > { %v521_v35 = vsel %vm489_vm5, %v2269_v17, 0.0  ;;  %v585_v59 = vmul.f32 %v520_v13, %v520_v13  ;;  %v2272_v17 = vsub.f32 %v2271_v52, %v1421_v46  ;;  %v2274_v13 = vld [vmem:[#allocation24_spill] sm:$0xff]  ;;  %v551_v22 = vsel %vm487_vm3, %v388_v28, 0.0 }
  0x9e   : > { %v586_v42 = vmul.f32 %v521_v35, %v521_v35  ;;  %v615_v9 = vadd.f32 %v614_v34, %v584_v53  ;;  %v2275_v36 = vsub.f32 %v2274_v13, %v1445_v54  ;;  %v2276_v34 = vld [vmem:[#allocation17_spill] sm:$0xff]  ;;  %v2278_v13 = vsub.f32 %v2277_v12, %v1448_v55 }
  0x9f   : > { %v522_v10 = vsel %vm490_vm6, %v2272_v17, 0.0  ;;  %v1802_v17 = vadd.s32 %v1302_v4, %v2276_v34  ;;  %v655_v51 = vmul.f32 %v550_v15, %v550_v15  ;;  %vm494_vm10 = vcmp.lt.s32.totalorder %v1776_v44, 1000 }
  0xa0   : > { %v523_v52 = vsel %vm491_vm7, %v2275_v36, 0.0  ;;  %v587_v33 = vmul.f32 %v522_v10, %v522_v10  ;;  %v616_v35 = vadd.f32 %v615_v9, %v585_v59  ;;  %v524_v43 = vsel %vm492_vm8, %v2278_v13, 0.0  ;;  %v2279_v10 = vld [vmem:[#allocation21_spill] sm:$0xff]  ;;  %v2280_v36 = vld [vmem:[#allocation26_spill] sm:$0xff] }
  0xa1   : > { %v552_v28 = vsel %vm488_vm4, %v389_v60, 0.0  ;;  %v588_v30 = vmul.f32 %v523_v52, %v523_v52  ;;  %v1814_v9 = vadd.s32 %v1302_v4, %v2279_v10  ;;  %v2281_v34 = vsub.f32 %v2280_v36, %v1451_v56  ;;  %v2283_v52 = vld [vmem:[#allocation22_spill] sm:$0xff] }
  0xa2   : > { %v617_v59 = vadd.f32 %v616_v35, %v586_v42  ;;  %v656_v53 = vmul.f32 %v551_v22, %v551_v22  ;;  %v685_v13 = vadd.f32 %v654_v26, %v653_v16  ;;  %vm495_vm11 = vcmp.lt.s32.totalorder %v1788_v11, 1000  ;;  %v2284_v10 = vld [vmem:[#allocation30_spill] sm:$0xff] }
  0xa3   : > { %v525_v12 = vsel %vm493_vm9, %v2281_v34, 0.0  ;;  %v2282_v40 = vsub.f32 %v1418_v45, %v1644_v62  ;;  %v589_v15 = vmul.f32 %v524_v43, %v524_v43  ;;  %v1829_v35 = vadd.s32 %v1302_v4, %v2283_v52 }
  0xa4   : > { %v618_v42 = vadd.f32 %v617_v59, %v587_v33  ;;  %v2285_v36 = vsub.f32 %v2284_v10, %v1474_v0  ;;  %v657_v26 = vmul.f32 %v552_v28, %v552_v28  ;;  %v686_v22 = vadd.f32 %v685_v13, %v655_v51  ;;  %v2287_v59 = vld [vmem:[#allocation23_spill] sm:$0xff] }
  0xa5   : > { %v553_v60 = vsel %vm489_vm5, %v2282_v40, 0.0  ;;  %vm496_vm12 = vcmp.lt.s32.totalorder %v1802_v17, 1000  ;;  %v2286_v45 = vsub.f32 %v1421_v46, %v1644_v62  ;;  %v590_v33 = vmul.f32 %v525_v12, %v525_v12  ;;  %v2288_v40 = vld [vmem:[#allocation31_spill] sm:$0xff] }
  0xa6   : > { %v526_v16 = vsel %vm494_vm10, %v2285_v36, 0.0  ;;  %v619_v43 = vadd.f32 %v618_v42, %v588_v30  ;;  %v1844_v34 = vadd.s32 %v1302_v4, %v2287_v59  ;;  %v2289_v52 = vsub.f32 %v2288_v40, %v1477_v1  ;;  %v2291_v42 = vld [vmem:[#allocation27_spill] sm:$0xff]  ;;  %v2292_v36 = vld [vmem:[#allocation32_spill] sm:$0xff]  ;;  %v2296_v40 = vld [vmem:[#allocation37_spill] sm:$0xff] }
  0xa7   : > { %v554_v63 = vsel %vm490_vm6, %v2286_v45, 0.0  ;;  %v658_v28 = vmul.f32 %v553_v60, %v553_v60  ;;  %v687_v13 = vadd.f32 %v686_v22, %v656_v53  ;;  %vm497_vm13 = vcmp.lt.s32.totalorder %v1814_v9, 1000 }
  0xa8   : > { %v527_v51 = vsel %vm495_vm11, %v2289_v52, 0.0  ;;  %v2290_v46 = vsub.f32 %v1445_v54, %v1644_v62  ;;  %v591_v30 = vmul.f32 %v526_v16, %v526_v16  ;;  %v620_v12 = vadd.f32 %v619_v43, %v589_v15  ;;  %v2295_v43 = vld [vmem:[#allocation28_spill] sm:$0xff] }
  0xa9   : > { %v1859_v10 = vadd.s32 %v1302_v4, %v2291_v42  ;;  %v2293_v45 = vsub.f32 %v2292_v36, %v1480_v3  ;;  %v659_v60 = vmul.f32 %v554_v63, %v554_v63  ;;  %v688_v22 = vadd.f32 %v687_v13, %v657_v26  ;;  %v2300_v42 = vld [vmem:[#allocation38_spill] sm:$0xff] }
  0xaa   : > { %v555_v2 = vsel %vm491_vm7, %v2290_v46, 0.0  ;;  %vm498_vm14 = vcmp.lt.s32.totalorder %v1829_v35, 1000  ;;  %v2294_v18 = vsub.f32 %v1448_v55, %v1644_v62  ;;  %v592_v15 = vmul.f32 %v527_v51, %v527_v51  ;;  %v2299_v46 = vld [vmem:[#allocation29_spill] sm:$0xff] }
  0xab   : > { %v528_v53 = vsel %vm496_vm12, %v2293_v45, 0.0  ;;  %v621_v16 = vadd.f32 %v620_v12, %v590_v33  ;;  %v1874_v59 = vadd.s32 %v1302_v4, %v2295_v43  ;;  %v2297_v52 = vsub.f32 %v2296_v40, %v1501_v5 }
  0xac   : > { %v556_v54 = vsel %vm492_vm8, %v2294_v18, 0.0  ;;  %v660_v63 = vmul.f32 %v555_v2, %v555_v2  ;;  %v689_v13 = vadd.f32 %v688_v22, %v658_v28  ;;  %vm499_vm15 = vcmp.lt.s32.totalorder %v1844_v34, 1000  ;;  %v2303_v22 = vld [vmem:[#allocation33_spill] sm:$0xff] }
  0xad   : > { %v529_v26 = vsel %vm497_vm13, %v2297_v52, 0.0  ;;  %v2298_v32 = vsub.f32 %v1451_v56, %v1644_v62  ;;  %v593_v33 = vmul.f32 %v528_v53, %v528_v53  ;;  %v622_v51 = vadd.f32 %v621_v16, %v591_v30  ;;  %v2304_v16 = vld [vmem:[#allocation39_spill] sm:$0xff] }
  0xae   : > { %v1889_v12 = vadd.s32 %v1302_v4, %v2299_v46  ;;  %v2301_v36 = vsub.f32 %v2300_v42, %v1504_v58  ;;  %v661_v2 = vmul.f32 %v556_v54, %v556_v54  ;;  %v690_v45 = vadd.f32 %v689_v13, %v659_v60  ;;  %v2310_v42 = vld [vmem:[#allocation35_spill] sm:$0xff] }
  0xaf   : > { %v557_v55 = vsel %vm493_vm9, %v2298_v32, 0.0  ;;  %vm500_vm0 = vcmp.lt.s32.totalorder %v1859_v10, 1000  ;;  %v2302_v19 = vsub.f32 %v1474_v0, %v1644_v62  ;;  %v594_v30 = vmul.f32 %v529_v26, %v529_v26  ;;  %v2307_v26 = vld [vmem:[#allocation34_spill] sm:$0xff] }
  0xb0   : > { %v530_v28 = vsel %vm498_vm14, %v2301_v36, 0.0  ;;  %v623_v53 = vadd.f32 %v622_v51, %v592_v15  ;;  %v1904_v18 = vadd.s32 %v1302_v4, %v2303_v22  ;;  %v2305_v43 = vsub.f32 %v2304_v16, %v1507_v6  ;;  %v2315_v16 = vld [vmem:[#allocation44_spill] sm:$0xff] }
  0xb1   : > { %v558_v56 = vsel %vm494_vm10, %v2302_v19, 0.0  ;;  %v662_v54 = vmul.f32 %v557_v55, %v557_v55  ;;  %v691_v40 = vadd.f32 %v690_v45, %v660_v63  ;;  %vm501_vm1 = vcmp.lt.s32.totalorder %v1874_v59, 1000 }
  0xb2   : > { %v531_v60 = vsel %vm499_vm15, %v2305_v43, 0.0  ;;  %v2306_v0 = vsub.f32 %v1477_v1, %v1644_v62  ;;  %v595_v15 = vmul.f32 %v530_v28, %v530_v28  ;;  %v624_v52 = vadd.f32 %v623_v53, %v593_v33  ;;  %v2314_v53 = vld [vmem:[#allocation40_spill] sm:$0xff] }
  0xb3   : > { %v1919_v13 = vadd.s32 %v1302_v4, %v2307_v26  ;;  %v2308_v32 = vsub.f32 %v1465_v61, %v1528_v7  ;;  %v663_v55 = vmul.f32 %v558_v56, %v558_v56  ;;  %v692_v51 = vadd.f32 %v691_v40, %v661_v2  ;;  %v2311_v61 = vld [vmem:[#allocation43_spill] sm:$0xff] }
  0xb4   : > { %v559_v44 = vsel %vm495_vm11, %v2306_v0, 0.0  ;;  %vm502_vm2 = vcmp.lt.s32.totalorder %v1889_v12, 1000  ;;  %v2309_v1 = vsub.f32 %v1480_v3, %v1644_v62  ;;  %v596_v33 = vmul.f32 %v531_v60, %v531_v60 }
  0xb5   : > { %v532_v63 = vsel %vm500_vm0, %v2308_v32, 0.0  ;;  %v625_v46 = vadd.f32 %v624_v52, %v594_v30  ;;  %v1934_v36 = vadd.s32 %v1302_v4, %v2310_v42  ;;  %v2312_v28 = vsub.f32 %v2311_v61, %v1531_v37 }
  0xb6   : > { %v560_v11 = vsel %vm496_vm12, %v2309_v1, 0.0  ;;  %v664_v45 = vmul.f32 %v559_v44, %v559_v44  ;;  %v693_v19 = vadd.f32 %v692_v51, %v662_v54  ;;  %vm503_vm3 = vcmp.lt.s32.totalorder %v1904_v18, 1000 }
  0xb7   : > { %v533_v2 = vsel %vm501_vm1, %v2312_v28, 0.0  ;;  %v2313_v3 = vsub.f32 %v1501_v5, %v1644_v62  ;;  %v597_v56 = vmul.f32 %v532_v63, %v532_v63  ;;  %v626_v30 = vadd.f32 %v625_v46, %v595_v15  ;;  %v2318_v15 = vld [vmem:[#allocation41_spill] sm:$0xff] }
  0xb8   : > { %v1949_v22 = vadd.s32 %v1302_v4, %v2314_v53  ;;  %v2316_v43 = vsub.f32 %v2315_v16, %v1534_v8  ;;  %v665_v54 = vmul.f32 %v560_v11, %v560_v11  ;;  %v694_v40 = vadd.f32 %v693_v19, %v663_v55  ;;  %v2321_v11 = vld [vmem:[#allocation42_spill] sm:$0xff]  ;;  %v2325_v19 = vld [vmem:[#allocation45_spill] sm:$0xff] }
  0xb9   : > { %v561_v17 = vsel %vm497_vm13, %v2313_v3, 0.0  ;;  %vm504_vm4 = vcmp.lt.s32.totalorder %v1919_v13, 1000  ;;  %v2317_v5 = vsub.f32 %v1504_v58, %v1644_v62  ;;  %v598_v0 = vmul.f32 %v533_v2, %v533_v2 }
  0xba   : > { %v534_v60 = vsel %vm502_vm2, %v2316_v43, 0.0  ;;  %v627_v44 = vadd.f32 %v626_v30, %v596_v33  ;;  %v1964_v52 = vadd.s32 %v1302_v4, %v2318_v15  ;;  %v2319_v26 = vsub.f32 %v1492_v57, %v1555_v25  ;;  %v2322_v57 = vld [vmem:[#allocation46_spill] sm:$0xff] }
  0xbb   : > { %v562_v9 = vsel %vm498_vm14, %v2317_v5, 0.0  ;;  %v666_v63 = vmul.f32 %v561_v17, %v561_v17  ;;  %v695_v55 = vadd.f32 %v694_v40, %v664_v45  ;;  %vm505_vm5 = vcmp.lt.s32.totalorder %v1934_v36, 1000  ;;  %v2326_v17 = vld [vmem:[#allocation47_spill] sm:$0xff] }
  0xbc   : > { %v535_v32 = vsel %vm503_vm3, %v2319_v26, 0.0  ;;  %v2320_v58 = vsub.f32 %v1507_v6, %v1644_v62  ;;  %v599_v51 = vmul.f32 %v534_v60, %v534_v60  ;;  %v628_v1 = vadd.f32 %v627_v44, %v597_v56 }
  0xbd   : > { %v1979_v33 = vadd.s32 %v1302_v4, %v2321_v11  ;;  %v2323_v46 = vsub.f32 %v2322_v57, %v1558_v49  ;;  %v667_v61 = vmul.f32 %v562_v9, %v562_v9  ;;  %v696_v28 = vadd.f32 %v695_v55, %v665_v54  ;;  %v2329_v54 = vld [vmem:[#allocation48_spill] sm:$0xff]  ;;  %v2335_v11 = vld [vmem:[#allocation50_spill] sm:$0xff] }
  0xbe   : > { %v563_v35 = vsel %vm499_vm15, %v2320_v58, 0.0  ;;  %vm506_vm6 = vcmp.lt.s32.totalorder %v1949_v22, 1000  ;;  %v2324_v6 = vsub.f32 %v1528_v7, %v1644_v62  ;;  %v600_v2 = vmul.f32 %v535_v32, %v535_v32  ;;  %v2332_v32 = vld [vmem:[#allocation49_spill] sm:$0xff] }
  0xbf   : > { %v536_v42 = vsel %vm504_vm4, %v2323_v46, 0.0  ;;  %v629_v45 = vadd.f32 %v628_v1, %v598_v0  ;;  %v1994_v3 = vadd.s32 %v1302_v4, %v2325_v19  ;;  %v2327_v56 = vsub.f32 %v2326_v17, %v1561_v48 }
  0xc0   : > { %v564_v34 = vsel %vm500_vm0, %v2324_v6, 0.0  ;;  %v668_v53 = vmul.f32 %v563_v35, %v563_v35  ;;  %v697_v16 = vadd.f32 %v696_v28, %v666_v63  ;;  %vm507_vm7 = vcmp.lt.s32.totalorder %v1964_v52, 1000 }
  0xc1   : > { %v537_v30 = vsel %vm505_vm5, %v2327_v56, 0.0  ;;  %v2328_v7 = vsub.f32 %v1531_v37, %v1644_v62  ;;  %v601_v43 = vmul.f32 %v536_v42, %v536_v42  ;;  %v630_v60 = vadd.f32 %v629_v45, %v599_v51 }
  0xc2   : > { %v2009_v40 = vadd.s32 %v1302_v4, %v2329_v54  ;;  %v2330_v5 = vsub.f32 %v1519_v47, %v1579_v24  ;;  %v669_v0 = vmul.f32 %v564_v34, %v564_v34  ;;  %v698_v44 = vadd.f32 %v697_v16, %v667_v61  ;;  %v2338_v34 = vld [vmem:[#allocation52_spill] sm:$0xff] }
  0xc3   : > { %v565_v10 = vsel %vm501_vm1, %v2328_v7, 0.0  ;;  %vm508_vm8 = vcmp.lt.s32.totalorder %v1979_v33, 1000  ;;  %v2331_v37 = vsub.f32 %v1534_v8, %v1644_v62  ;;  %v602_v15 = vmul.f32 %v537_v30, %v537_v30 }
  0xc4   : > { %v538_v9 = vsel %vm506_vm6, %v2330_v5, 0.0  ;;  %v631_v26 = vadd.f32 %v630_v60, %v600_v2  ;;  %v2024_v63 = vadd.s32 %v1302_v4, %v2332_v32  ;;  %v2333_v47 = vsub.f32 %v1522_v39, %v1582_v14  ;;  %v2344_v5 = vld [vmem:[#allocation58_spill] sm:$0xff] }
  0xc5   : > { %v566_v59 = vsel %vm502_vm2, %v2331_v37, 0.0  ;;  %v670_v58 = vmul.f32 %v565_v10, %v565_v10  ;;  %v699_v35 = vadd.f32 %v698_v44, %v668_v53  ;;  %vm509_vm9 = vcmp.lt.s32.totalorder %v1994_v3, 1000  ;;  %v2341_v53 = vld [vmem:[#allocation54_spill] sm:$0xff]  ;;  %v2358_v3 = vld [vmem:[#allocation60_spill] sm:$0xff] }
  0xc6   : > { %v539_v55 = vsel %vm507_vm7, %v2333_v47, 0.0  ;;  %v2334_v8 = vsub.f32 %v1555_v25, %v1644_v62  ;;  %v603_v51 = vmul.f32 %v538_v9, %v538_v9  ;;  %v632_v1 = vadd.f32 %v631_v26, %v601_v43 }
  0xc7   : > { %v2039_v57 = vadd.s32 %v1302_v4, %v2335_v11  ;;  %v2336_v39 = vsub.f32 %v1525_v38, %v1585_v29  ;;  %v671_v42 = vmul.f32 %v566_v59, %v566_v59  ;;  %v700_v61 = vadd.f32 %v699_v35, %v669_v0 }
  0xc8   : > { %v567_v12 = vsel %vm503_vm3, %v2334_v8, 0.0  ;;  %vm510_vm10 = vcmp.lt.s32.totalorder %v2009_v40, 1000  ;;  %v2337_v25 = vsub.f32 %v1558_v49, %v1644_v62  ;;  %v604_v28 = vmul.f32 %v539_v55, %v539_v55  ;;  %v2350_v8 = vld [vmem:[#allocation51_spill] sm:$0xff] }
  0xc9   : > { %v540_v46 = vsel %vm508_vm8, %v2336_v39, 0.0  ;;  %v633_v6 = vadd.f32 %v632_v1, %v602_v15  ;;  %v2054_v2 = vadd.s32 %v1302_v4, %v2338_v34  ;;  %v2339_v38 = vsub.f32 %v1546_v27, %v1600_v41 }
  0xca   : > { %v568_v18 = vsel %vm504_vm4, %v2337_v25, 0.0  ;;  %v672_v19 = vmul.f32 %v567_v12, %v567_v12  ;;  %v701_v17 = vadd.f32 %v700_v61, %v670_v58  ;;  %vm511_vm11 = vcmp.lt.s32.totalorder %v2024_v63, 1000  ;;  %v2351_v12 = vld [vmem:[#allocation57_spill] sm:$0xff]  ;;  %v2355_v61 = vld [vmem:[#allocation59_spill] sm:$0xff] }
  0xcb   : > { %v541_v45 = vsel %vm509_vm9, %v2339_v38, 0.0  ;;  %v2340_v49 = vsub.f32 %v1561_v48, %v1644_v62  ;;  %v605_v56 = vmul.f32 %v540_v46, %v540_v46  ;;  %v634_v30 = vadd.f32 %v633_v6, %v603_v51 }
  0xcc   : > { %v482_v16 = vadd.s32 %v1302_v4, %v2341_v53  ;;  %v2342_v27 = vsub.f32 %v1549_v21, %v1603_v23  ;;  %v673_v10 = vmul.f32 %v568_v18, %v568_v18  ;;  %v702_v43 = vadd.f32 %v701_v17, %v671_v42  ;;  %v2354_v42 = vld [vmem:[#allocation53_spill] sm:$0xff] }
  0xcd   : > { %v569_v13 = vsel %vm505_vm5, %v2340_v49, 0.0  ;;  %vm512_vm12 = vcmp.lt.s32.totalorder %v2039_v57, 1000  ;;  %v2343_v48 = vsub.f32 %v1579_v24, %v1644_v62  ;;  %v606_v60 = vmul.f32 %v541_v45, %v541_v45  ;;  %v2357_v45 = vld [vmem:[#allocation55_spill] sm:$0xff] }
  0xce   : > { %v542_v7 = vsel %vm510_vm10, %v2342_v27, 0.0  ;;  %v635_v54 = vadd.f32 %v634_v30, %v604_v28  ;;  %v483_v9 = vadd.s32 %v1302_v4, %v2344_v5  ;;  %v2345_v21 = vsub.f32 %v1552_v20, %v1606_v50  ;;  %v2347_v20 = vld [vmem:[#allocation56_spill] sm:$0xff] }
  0xcf   : > { %v570_v36 = vsel %vm506_vm6, %v2343_v48, 0.0  ;;  %v674_v44 = vmul.f32 %v569_v13, %v569_v13  ;;  %v703_v37 = vadd.f32 %v702_v43, %v672_v19  ;;  %vm513_vm13 = vcmp.lt.s32.totalorder %v2054_v2, 1000 }
  0xd0   : > { %v543_v0 = vsel %vm511_vm11, %v2345_v21, 0.0  ;;  %v2346_v24 = vsub.f32 %v1582_v14, %v1644_v62  ;;  %v607_v59 = vmul.f32 %v542_v7, %v542_v7  ;;  %v636_v15 = vadd.f32 %v635_v54, %v605_v56 }
  0xd1   : > { %v411_v4 = vsub.f32 %v1603_v23, %v1644_v62  ;;  %v2348_v26 = vsub.f32 %v1573_v31, %v2347_v20  ;;  %v675_v47 = vmul.f32 %v570_v36, %v570_v36  ;;  %v704_v55 = vadd.f32 %v703_v37, %v673_v10 }
  0xd2   : > { %v571_v22 = vsel %vm507_vm7, %v2346_v24, 0.0  ;;  %vm514_vm14 = vcmp.lt.s32.totalorder %v482_v16, 1000  ;;  %v2349_v14 = vsub.f32 %v1585_v29, %v1644_v62  ;;  %v608_v58 = vmul.f32 %v543_v0, %v543_v0 }
  0xd3   : > { %v544_v32 = vsel %vm512_vm12, %v2348_v26, 0.0  ;;  %v637_v35 = vadd.f32 %v636_v15, %v606_v60  ;;  %v412_v23 = vsub.f32 %v1606_v50, %v1644_v62  ;;  %v2352_v31 = vsub.f32 %v2350_v8, %v2351_v12 }
  0xd4   : > { %v572_v52 = vsel %vm508_vm8, %v2349_v14, 0.0  ;;  %v676_v1 = vmul.f32 %v571_v22, %v571_v22  ;;  %v705_v11 = vadd.f32 %v704_v55, %v674_v44  ;;  %vm515_vm15 = vcmp.lt.s32.totalorder %v483_v9, 1000 }
  0xd5   : > { %v545_v51 = vsel %vm513_vm13, %v2352_v31, 0.0  ;;  %v2353_v29 = vsub.f32 %v1600_v41, %v1644_v62  ;;  %v609_v39 = vmul.f32 %v544_v32, %v544_v32  ;;  %v638_v46 = vadd.f32 %v637_v35, %v607_v59 }
  0xd6   : > { %v2356_v50 = vsub.f32 %v2354_v42, %v2355_v61  ;;  %v677_v18 = vmul.f32 %v572_v52, %v572_v52  ;;  %v706_v28 = vadd.f32 %v705_v11, %v675_v47  ;;  %v413_v6 = vsub.f32 %v2347_v20, %v1644_v62 }
  0xd7   : > { %v573_v33 = vsel %vm509_vm9, %v2353_v29, 0.0  ;;  %v574_v34 = vsel %vm510_vm10, %v411_v4, 0.0  ;;  %v610_v38 = vmul.f32 %v545_v51, %v545_v51  ;;  %v639_v41 = vadd.f32 %v638_v46, %v608_v58  ;;  %v580_v58 = vld [vmem:[#allocation2] sm:$0x1]  ;;  %v652_v51 = vld [vmem:[#allocation3] sm:$0x1] }
  0xd8   : > { %v546_v25 = vsel %vm514_vm14, %v2356_v50, 0.0  ;;  %v2359_v19 = vsub.f32 %v2357_v45, %v2358_v3  ;;  %v678_v49 = vmul.f32 %v573_v33, %v573_v33  ;;  %v707_v13 = vadd.f32 %v706_v28, %v676_v1 }
  0xd9   : > { %v414_v56 = vsub.f32 %v2351_v12, %v1644_v62  ;;  %v575_v30 = vsel %vm511_vm11, %v412_v23, 0.0  ;;  %v611_v53 = vmul.f32 %v546_v25, %v546_v25  ;;  %v640_v27 = vadd.f32 %v639_v41, %v609_v39 }
  0xda   : > { %v547_v17 = vsel %vm515_vm15, %v2359_v19, 0.0  ;;  %v679_v7 = vmul.f32 %v574_v34, %v574_v34  ;;  %v708_v40 = vadd.f32 %v707_v13, %v677_v18  ;;  %v415_v10 = vsub.f32 %v2355_v61, %v1644_v62 }
  0xdb   : > { %v576_v43 = vsel %vm512_vm12, %v413_v6, 0.0  ;;  %v612_v48 = vmul.f32 %v547_v17, %v547_v17  ;;  %v641_v36 = vadd.f32 %v640_v27, %v610_v38  ;;  %v680_v60 = vmul.f32 %v575_v30, %v575_v30 }
  0xdc   : > { %v709_v54 = vadd.f32 %v708_v40, %v678_v49  ;;  %v416_v5 = vsub.f32 %v2358_v3, %v1644_v62  ;;  %v577_v63 = vsel %vm513_vm13, %v414_v56, 0.0  ;;  %v681_v0 = vmul.f32 %v576_v43, %v576_v43 }
  0xdd   : > { %v642_v21 = vadd.f32 %v641_v36, %v611_v53  ;;  %v578_v37 = vsel %vm514_vm14, %v415_v10, 0.0  ;;  %v682_v22 = vmul.f32 %v577_v63, %v577_v63  ;;  %vm736_vm0 = vcmask (!%p906_p7), 1040384  }
  0xde   : > { %v710_v44 = vadd.f32 %v709_v54, %v679_v7  ;;  %v579_v57 = vsel %vm515_vm15, %v416_v5, 0.0  ;;  %v683_v4 = vmul.f32 %v578_v37, %v578_v37  ;;  %v1119_v18 = vmov (!%p906_p7), 1.0  }
  0xdf   : > { %v643_v24 = vadd.f32 %v642_v21, %v612_v48  ;;  %v684_v32 = vmul.f32 %v579_v57, %v579_v57 }
  0xe0   : > { %v711_v59 = vadd.f32 %v710_v44, %v680_v60 }
  0xe1   : > { %v644_v15 = vrot.slane %v643_v24, 4 }
  0xe2   : > { %v712_v20 = vadd.f32 %v711_v59, %v681_v0 }
  0xe3   : > { %v645_v26 = vadd.f32 %v644_v15, %v643_v24 }
  0xe4   : > { %v713_v47 = vadd.f32 %v712_v20, %v682_v22 }
  0xe5   : > { %v646_v62 = vrot.slane %v645_v26, 2 }
  0xe6   : > { %v714_v55 = vadd.f32 %v713_v47, %v683_v4 }
  0xe7   : > { %v647_v2 = vadd.f32 %v646_v62, %v645_v26 }
  0xe8   : > { %v715_v14 = vadd.f32 %v714_v55, %v684_v32 }
  0xe9   : > { %v648_v52 = vrot.slane %v647_v2, 1 }
  0xea   : > { %v716_v35 = vrot.slane %v715_v14, 4 }
  0xeb   : > { %v649_v16 = vadd.f32 %v648_v52, %v647_v2 }
  0xec   : > { %v717_v23 = vadd.f32 %v716_v35, %v715_v14 }
  0xed   : > { %v650_v8 = vadd.f32 %v649_v16, %v580_v58 }
  0xee   : > { %v718_v12 = vrot.slane %v717_v23, 2 }
  0xef   : > { %651 = vst [vmem:[#allocation2] sm:$0x1] %v650_v8 }
  0xf0   : > { %v719_v9 = vadd.f32 %v718_v12, %v717_v23 }
  0xf2   : > { %v720_v31 = vrot.slane %v719_v9, 1  ;;  %727 = sbr.rel (%p906_p7) target bundleno = 486 (0x1e6), region = 48 }
  0xf4   : > { %v721_v1 = vadd.f32 %v720_v31, %v719_v9 }
  0xf6   : > { %v722_v11 = vadd.f32 %v721_v1, %v652_v51  ;;  %v728_v29 = vld [vmem:[#allocation2] sm:$0x1] (!%p906_p7) }
  0xf7   : > { %v762_v46 = vsel (!%p906_p7), %vm736_vm0, %v728_v29, 0.0 }
  0xf8   : > { %723 = vst [vmem:[#allocation3] sm:$0x1] %v722_v11  ;;  %763 = vadd.xlane.f32.xlu1 (!%p906_p7), %v762_v46 }
  0xff   : > { %v729_v33 = vld [vmem:[#allocation3] sm:$0x1] }
 0x100   : > { %v730_v39 = vadd.f32 1e-08, %v729_v33 }
 0x102   : > { %982 = vrcp.f32 %v730_v39 }
 0x10c   : > { %v983_v42 = vpop.eup %982 }
 0x10d   : > { %v732_v61 = vmul.f32 %v983_v42, %v728_v29 }
 0x10f   : > { %v733_v50 = vsub.f32 1.0, %v732_v61 }
 0x111   : > { %vm734_vm1 = vcmp.ne.f32.partialorder %v733_v50, %v733_v50 }
 0x112   : > { %v735_v25 = vsel %vm734_vm1, 0.0, %v733_v50  ;;  %v749_v28 = vsel %vm734_vm1, 0.0, %v1119_v18 }
 0x113   : > { %v737_v6 = vsel %vm736_vm0, %v735_v25, 0.0  ;;  %v750_v34 = vsel %vm736_vm0, %v749_v28, 0.0 }
 0x114   : > { %738 = vadd.xlane.f32.xlu0 %v737_v6 }
 0x118   : > { %751 = vadd.xlane.f32.xlu0 %v750_v34 }
 0x185   : > { %v764_v38 = vpop.xlane.xlu1 %763 }
 0x186   : > { %v765_v41 = vrot.slane %v764_v38, 4 }
 0x188   : > { %v766_v45 = vadd.f32 %v765_v41, %v764_v38 }
 0x18a   : > { %v767_v49 = vrot.slane %v766_v45, 2 }
 0x18c   : > { %v768_v7 = vadd.f32 %v767_v49, %v766_v45 }
 0x18e   : > { %v769_v36 = vrot.slane %v768_v7, 1 }
 0x190   : > { %v770_v5 = vadd.f32 %v769_v36, %v768_v7 }
 0x1a1   : > { %v739_v3 = vpop.xlane.xlu0 %738 }
 0x1a2   : > { %v740_v19 = vrot.slane %v739_v3, 4 }
 0x1a4   : > { %v741_v17 = vadd.f32 %v740_v19, %v739_v3 }
 0x1a5   : > { %v752_v13 = vpop.xlane.xlu0 %751 }
 0x1a6   : > { %v742_v56 = vrot.slane %v741_v17, 2  ;;  %v753_v30 = vrot.slane %v752_v13, 4 }
 0x1a8   : > { %v754_v53 = vadd.f32 %v753_v30, %v752_v13  ;;  %v743_v27 = vadd.f32 %v742_v56, %v741_v17 }
 0x1aa   : > { %v755_v40 = vrot.slane %v754_v53, 2  ;;  %v744_v10 = vrot.slane %v743_v27, 1 }
 0x1ac   : > { %v756_v43 = vadd.f32 %v755_v40, %v754_v53  ;;  %v745_v48 = vadd.f32 %v744_v10, %v743_v27 }
 0x1ae   : > { %913 = vpush %v745_v48  ;;  %v757_v60 = vrot.slane %v756_v43, 1 }
 0x1b0   : > { %v758_v54 = vadd.f32 %v757_v60, %v756_v43 }
 0x1b2   : > { %915 = vpush %v758_v54 }
 0x1b3   : > { %917 = vpush %v770_v5 }
 0x1df   : > { %s914_s15 = spop %913 }
 0x1e0   : > { %748 = sst [smem:[#allocation9]] %s914_s15 }
 0x1e3   : > { %s916_s5 = spop %915 }
 0x1e4   : > { %761 = sst [smem:[#allocation9 + $0x1]] %s916_s5  ;;  %s918_s6 = spop %917 }
 0x1e5   : > { %773 = sst [smem:[#allocation9 + $0x2]] %s918_s6 }
 0x1e6 PF: > { %p925_p12 = scmp.eq.s32.totalorder %s882_s18, 3  ;;  %s1040_s11 = scalar_lea.hbm %s2179_s3, 16 }
 0x1e7   : > { %p1041_p0 = scmp.ne.s32.totalorder %s2179_s3, %s1040_s11  ;;  %p1046_p13 = scmp.lt.u32.totalorder %s1040_s11, %s2179_s3 }
 0x1e9   : > { %p1042_p1 = pnand %p1041_p0, %p925_p12 }
 0x1eb   : > { %p1043_p2 = pneg %p1042_p1 }
 0x1ed   : > { %p1048_p10 = pnand %p1046_p13, %p1043_p2 }
 0x1ef   : > { %1051 = shalt.err (!%p1048_p10)
}
 0x1f0   : > { %s1120_s21 = smov [#allocation9]  }
 0x1f1   : > { %922 = dma.smem_to_hbm (%p925_p12), %s1120_s21, 16, %s2179_s3, [#allocation6]  }
 0x1f2   : > { %1085 = dma.done.wait (%p925_p12), [#allocation6], 16  }
 0x1f3   : > { %1087 = vsyncadd (%p925_p12), [#allocation6], 4294967280 }
 0x1f4   : > { %789 = sfence }
 0x1f5 PF: > { %s20_s17 = sadd.s32 1, %s1110_s17   ;;  %s2360_s12 = smov %s1094_s13 }
 0x1f6   : > { %p17_p4 = scmp.ge.s32.totalorder %s20_s17, 6   ;;  %s2361_s13 = smov %s1098_s14 }
 0x1f7   : > { %s2362_s14 = smov %s1191_s24  ;;  %s2363_s15 = smov %s1106_s16 }
 0x1f8   : > { %s2364_s16 = smov %s2366_s19  ;;  %19 = sbr.rel (!%p17_p4) target bundleno = 7 (0x7), region = 97 }
 0x1ff   :  { %795 = vsyncpa [#allocation5], 1 }
 0x200   :  { %797 = vsyncpa [#allocation5 + $0x1], 1 }
 0x201   :  { %798 = vsyncpa [#allocation8], 1 }
 0x202   :  { %800 = vsyncpa [#allocation8 + $0x1], 1 }
 0x203   :  { %801 = vsyncpa [#allocation6], 1 }
 0x204   :  { %803 = vsyncpa [#allocation6 + $0x1], 1 }

</bundles_post_ra>
